<compile_context>
chip_gen: v5e
topology: v5e:2x2
jax: 0.10.0
libtpu: 0.0.40
codegen_flags: <defaults>
</compile_context>

<pallas_src>
import functools

import jax
import jax.numpy as jnp
from jax import lax
from jax.experimental import pallas as pl
from jax.experimental.pallas import tpu as pltpu

EPS = 1e-5


def _round_up(n: int, m: int) -> int:
    return ((n + m - 1) // m) * m


def _ln_kernel(x_ref, wb_ref, o_ref, *, feat: int):
    """Per-column LayerNorm.

    x_ref : (feat, b_tile)   one instance per lane (column)
    wb_ref: (2*feat, 1)      rows [0:feat] = weight, rows [feat:2feat] = bias
    o_ref : (feat, b_tile)
    """
    x = x_ref[...].astype(jnp.float32)                      # (feat, bt)
    inv_n = 1.0 / feat
    mean = jnp.sum(x, axis=0, keepdims=True) * inv_n        # (1, bt) sublane reduce
    c = x - mean
    var = jnp.sum(c * c, axis=0, keepdims=True) * inv_n     # biased variance
    inv = lax.rsqrt(var + EPS)
    w = wb_ref[0:feat, :].astype(jnp.float32)               # (feat, 1) -> lane splat
    b = wb_ref[feat:2 * feat, :].astype(jnp.float32)
    o_ref[...] = (c * inv * w + b).astype(o_ref.dtype)


def layer_norm_batched(xb, weight, bias, *, b_tile: int = 512):
    """LayerNorm over all non-batch dims of each instance in `xb`.

    xb    : (B, *normalized_shape)  e.g. (B, 1, 2, 2)
    weight: normalized_shape        e.g. (1, 2, 2)
    bias  : normalized_shape
    """
    assert b_tile % 128 == 0
    B = xb.shape[0]
    feat = 1
    for d in xb.shape[1:]:
        feat *= d

    # Lane-dense layout: (feat, B) with B padded to a multiple of 128 lanes.
    Bp = _round_up(max(B, 1), 128)
    if Bp <= b_tile:
        bt = Bp
    else:
        Bp = _round_up(Bp, b_tile)
        bt = b_tile
    grid = (Bp // bt,)

    x2 = xb.reshape(B, feat).T                              # (feat, B)
    x2 = jnp.pad(x2, ((0, 0), (0, Bp - B)))                 # (feat, Bp)

    # Pack affine params into a single input (one DMA instead of two).
    wb = jnp.concatenate(
        [weight.reshape(feat, 1), bias.reshape(feat, 1)], axis=0
    ).astype(jnp.float32)                                   # (2*feat, 1)

    out2 = pl.pallas_call(
        functools.partial(_ln_kernel, feat=feat),
        out_shape=jax.ShapeDtypeStruct((feat, Bp), xb.dtype),
        grid=grid,
        in_specs=[
            pl.BlockSpec((feat, bt), lambda i: (0, i)),
            pl.BlockSpec((2 * feat, 1), lambda i: (0, 0)),
        ],
        out_specs=pl.BlockSpec((feat, bt), lambda i: (0, i)),
        compiler_params=pltpu.CompilerParams(
            dimension_semantics=("parallel",)),
    )(x2, wb)

    return out2[:, :B].T.reshape(xb.shape)


def model_forward(x1, weight, bias):
    """Exact module semantics: LayerNorm([1,2,2]) applied to x1 of shape (1,2,2)."""
    return layer_norm_batched(x1[None], weight, bias)[0]


def layer_norm_ref(xb, weight, bias, eps=EPS):
    """Pure-JAX reference (per-instance LayerNorm over all non-batch dims)."""
    xf = xb.astype(jnp.float32)
    axes = tuple(range(1, xb.ndim))
    mean = jnp.mean(xf, axis=axes, keepdims=True)
    var = jnp.mean((xf - mean) ** 2, axis=axes, keepdims=True)
    y = (xf - mean) * lax.rsqrt(var + eps)
    return (y * weight.astype(jnp.float32) + bias.astype(jnp.float32)).astype(xb.dtype)


if __name__ == "__main__":
    key = jax.random.PRNGKey(0)
    k_single, k_batch = jax.random.split(key)

    # LayerNorm([1, 2, 2]) defaults: weight = ones, bias = zeros, eps = 1e-5.
    weight = jnp.ones((1, 2, 2), dtype=jnp.float32)
    bias = jnp.zeros((1, 2, 2), dtype=jnp.float32)

    # 1) Module-exact case: x1 = randn(1, 2, 2).
    x1 = jax.random.normal(k_single, (1, 2, 2), dtype=jnp.float32)
    out = jax.block_until_ready(model_forward(x1, weight, bias))
    ref = layer_norm_ref(x1[None], weight, bias)[0]
    assert out.shape == (1, 2, 2)
    assert jnp.allclose(out, ref, atol=1e-5, rtol=1e-5), (out, ref)

    # 2) Batched case (amortizes launch cost; exercises grid + lane padding).
    xb = jax.random.normal(k_batch, (1000, 1, 2, 2), dtype=jnp.float32)
    outb = jax.block_until_ready(layer_norm_batched(xb, weight, bias))
    refb = layer_norm_ref(xb, weight, bias)
    assert outb.shape == xb.shape
    assert jnp.allclose(outb, refb, atol=1e-5, rtol=1e-5)

    print("KERNEL_OK")
</pallas_src>

<mosaic_0001>
module attributes {stable_mosaic.version = 11 : i64} {
  func.func @_ln_kernel(%arg0: i32, %arg1: memref<4x128xf32, #tpu.memory_space<vmem>>, %arg2: memref<8x1xf32, #tpu.memory_space<vmem>>, %arg3: memref<4x128xf32, #tpu.memory_space<vmem>>) attributes {dimension_semantics = [#tpu.dimension_semantics<parallel>], iteration_bounds = array<i64: 1>, scalar_prefetch = 0 : i64, scratch_operands = 0 : i64, tpu.core_type = #tpu.core_type<tc>, window_params = [{transform_indices = @transform_0, window_bounds = array<i64: 4, 128>}, {pipeline_mode = #tpu.pipeline_mode<synchronous>, transform_indices = @transform_1, window_bounds = array<i64: 8, 1>}, {transform_indices = @transform_2, window_bounds = array<i64: 4, 128>}]} {
    %c0 = arith.constant 0 : index
    %c0_0 = arith.constant 0 : index
    %0 = vector.load %arg1[%c0, %c0_0] : memref<4x128xf32, #tpu.memory_space<vmem>>, vector<4x128xf32>
    %cst = arith.constant dense<0.000000e+00> : vector<128xf32>
    %1 = vector.multi_reduction <add>, %0, %cst [0] : vector<4x128xf32> to vector<128xf32>
    %2 = vector.shape_cast %1 : vector<128xf32> to vector<1x128xf32>
    %cst_1 = arith.constant 2.500000e-01 : f32
    %3 = vector.broadcast %cst_1 : f32 to vector<1x128xf32>
    %4 = arith.mulf %2, %3 : vector<1x128xf32>
    %5 = vector.broadcast %4 : vector<1x128xf32> to vector<4x128xf32>
    %6 = arith.subf %0, %5 : vector<4x128xf32>
    %7 = arith.mulf %6, %6 : vector<4x128xf32>
    %cst_2 = arith.constant dense<0.000000e+00> : vector<128xf32>
    %8 = vector.multi_reduction <add>, %7, %cst_2 [0] : vector<4x128xf32> to vector<128xf32>
    %9 = vector.shape_cast %8 : vector<128xf32> to vector<1x128xf32>
    %cst_3 = arith.constant 2.500000e-01 : f32
    %10 = vector.broadcast %cst_3 : f32 to vector<1x128xf32>
    %11 = arith.mulf %9, %10 : vector<1x128xf32>
    %cst_4 = arith.constant 9.99999974E-6 : f32
    %12 = vector.broadcast %cst_4 : f32 to vector<1x128xf32>
    %13 = arith.addf %11, %12 : vector<1x128xf32>
    %14 = math.rsqrt %13 : vector<1x128xf32>
    %c0_5 = arith.constant 0 : index
    %c0_6 = arith.constant 0 : index
    %15 = vector.load %arg2[%c0_5, %c0_6] : memref<8x1xf32, #tpu.memory_space<vmem>>, vector<4x1xf32>
    %c4 = arith.constant 4 : index
    %c0_7 = arith.constant 0 : index
    %16 = vector.load %arg2[%c4, %c0_7] : memref<8x1xf32, #tpu.memory_space<vmem>>, vector<4x1xf32>
    %17 = vector.broadcast %14 : vector<1x128xf32> to vector<4x128xf32>
    %18 = arith.mulf %6, %17 : vector<4x128xf32>
    %19 = vector.broadcast %15 : vector<4x1xf32> to vector<4x128xf32>
    %20 = arith.mulf %18, %19 : vector<4x128xf32>
    %21 = vector.broadcast %16 : vector<4x1xf32> to vector<4x128xf32>
    %22 = arith.addf %20, %21 : vector<4x128xf32>
    %c0_8 = arith.constant 0 : index
    %c0_9 = arith.constant 0 : index
    %23 = vector.load %arg3[%c0_8, %c0_9] : memref<4x128xf32, #tpu.memory_space<vmem>>, vector<4x128xf32>
    tpu.vector_store %arg3[%c0_8, %c0_9], %22 {strides = array<i32>} : memref<4x128xf32, #tpu.memory_space<vmem>>, vector<4x128xf32>,
    return
  }
  func.func @transform_0(%arg0: i32) -> (i32, i32) {
    %c0_i32 = arith.constant 0 : i32
    %c0_i32_0 = arith.constant 0 : i32
    return %c0_i32, %arg0 : i32, i32
  }
  func.func @transform_1(%arg0: i32) -> (i32, i32) {
    %c0_i32 = arith.constant 0 : i32
    %c0_i32_0 = arith.constant 0 : i32
    %c0_i32_1 = arith.constant 0 : i32
    return %c0_i32, %c0_i32_0 : i32, i32
  }
  func.func @transform_2(%arg0: i32) -> (i32, i32) {
    %c0_i32 = arith.constant 0 : i32
    %c0_i32_0 = arith.constant 0 : i32
    return %c0_i32, %arg0 : i32, i32
  }
}

</mosaic_0001>

<bundles_post_ra>
// kernel: tpu_custom_call.1
= control target key start
LH: loop header
LB: loop body
LE: loop exit
PB: predicated region body
PF: predicated region fallthrough
CT: control target
= control target key end

     0   :  { %v106_v1 = vmov 0   ;;  %s135_s0 = inlined_call_operand.vmem [shape: f32[4,128], index: 0, kind: input, shape index: {}]   ;;  %s136_s1 = inlined_call_operand.vmem [shape: f32[8,1], index: 1, kind: input, shape index: {}]   ;;  %s137_s2 = inlined_call_operand.hbm [shape: f32[4,128], index: 2, kind: output, shape index: {}]  }
   0x1   :  { %v43_v0 = vld [vmem:[%s136_s1] sm:$0xf]  ;;  %77 = vset.pattern.permute.xlu0 %v106_v1 }
   0x2   :  { %7 = vsyncpa [#allocation3], 0  ;;  %48 = vperm.xlu0 %77, %v43_v0   ;;  %v44_v2 = vld [vmem:[%s136_s1 + $0x4] sm:$0xf]  ;;  %v12_v3 = vld [vmem:[%s135_s0] sm:$0xf] }
   0x3   :  { %vm13_vm0 = vcmask 1043456   ;;  %s107_s0 = smov [#allocation2]   ;;  %s66_s17 = sshll.u32 %s137_s2, 4  ;;  %s67_s17 = int_to_ptr.hbm [resolvable:$true] %s66_s17 }
   0x4   :  { %v14_v4 = vsel %vm13_vm0, %v12_v3, 0.0  ;;  %s64_s1 = sshll.u32 %s107_s0, 4  ;;  %s65_s1 = int_to_ptr.vmem [resolvable:$true] %s64_s1 }
   0x5   :  { %v15_v5 = vrot.slane %v14_v4, 4 }
   0x7   :  { %v16_v6 = vadd.f32 %v15_v5, %v14_v4 }
   0x9   :  { %v17_v7 = vrot.slane %v16_v6, 2 }
   0xa   :  { %54 = vperm.xlu0 %77, %v44_v2  }
   0xb   :  { %v18_v8 = vadd.f32 %v17_v7, %v16_v6 }
   0xd   :  { %v19_v9 = vrot.slane %v18_v8, 1 }
   0xf   :  { %v20_v10 = vadd.f32 %v19_v9, %v18_v8 }
  0x11   :  { %v21_v11 = vmul.f32 0.25, %v20_v10 }
  0x13   :  { %v22_v12 = vsub.f32 %v12_v3, %v21_v11 }
  0x15   :  { %v23_v13 = vmul.f32 %v22_v12, %v22_v12 }
  0x17   :  { %v24_v14 = vsel %vm13_vm0, %v23_v13, 0.0 }
  0x18   :  { %v25_v15 = vrot.slane %v24_v14, 4 }
  0x1a   :  { %v26_v16 = vadd.f32 %v25_v15, %v24_v14 }
  0x1c   :  { %v27_v17 = vrot.slane %v26_v16, 2 }
  0x1e   :  { %v28_v18 = vadd.f32 %v27_v17, %v26_v16 }
  0x20   :  { %v29_v19 = vrot.slane %v28_v18, 1 }
  0x22   :  { %v30_v20 = vadd.f32 %v29_v19, %v28_v18 }
  0x24   :  { %v31_v21 = vmul.f32 0.25, %v30_v20 }
  0x26   :  { %v32_v22 = vadd.f32 1e-05, %v31_v21 }
  0x28   :  { %78 = vrsqrt.f32 %v32_v22  ;;  %vm39_vm1 = vweird.f32 %v32_v22 }
  0x2e   :  { %v79_v23 = vpop.eup %78 }
  0x2f   :  { %v34_v24 = vmul.f32 %v79_v23, %v32_v22  ;;  %vm40_vm2 = vweird.f32 %v79_v23 }
  0x30   :  { %vm41_vm3 = vmor %vm39_vm1, %vm40_vm2 }
  0x31   :  { %v35_v25 = vmul.f32 %v79_v23, %v34_v24 }
  0x33   :  { %v36_v26 = vmul.f32 0.5, %v35_v25 }
  0x35   :  { %v37_v27 = vsub.f32 1.5, %v36_v26 }
  0x37   :  { %v38_v28 = vmul.f32 %v79_v23, %v37_v27 }
  0x39   :  { %v42_v30 = vsel %vm41_vm3, %v79_v23, %v38_v28 }
  0x3a   :  { %v45_v31 = vmul.f32 %v42_v30, %v22_v12 }
  0x74   :  { %v49_v29 = vpop.permute.xlu0 %48 }
  0x75   :  { %v51_v32 = vmul.f32 %v49_v29, %v45_v31 }
  0x7c   :  { %v55_v33 = vpop.permute.xlu0 %54 }
  0x7d   :  { %v57_v34 = vadd.f32 %v55_v33, %v51_v32 }
  0x7f   :  { %58 = vst [vmem:[#allocation2] sm:$0xf] %v57_v34 }
  0x80   :  { %69 = dma.vmem_to_hbm [thread:$0]  %s65_s1, 64, %s67_s17, [#allocation3]  }
  0x81   :  { %104 = dma.done.wait [#allocation3], 64  }
  0x82   :  { %105 = vsyncadd [#allocation3], 4294967232 }
  0x83   :  { %74 = vsyncpa [#allocation3], 1 }

</bundles_post_ra>
